<compile_context>
chip_gen: v7x
topology: tpu7x:2x2x1
jax: 0.10.0
libtpu: 0.0.40
codegen_flags: <defaults>
</compile_context>

<pallas_src>
import math

import jax
import jax.numpy as jnp
from jax.experimental import pallas as pl
from jax.experimental.pallas import tpu as pltpu


def qnaive_kernel(state_ref, w1_ref, b1_ref, w2_ref, b2_ref, out_ref):
    # Layer 1: [TB,1] x [1,H] is an outer product -> broadcast FMA on the VPU.
    s = state_ref[...]                                   # [TB, 1] f32
    h = s * w1_ref[...] + b1_ref[...]                    # [TB, H] broadcast FMA
    h = jnp.maximum(h, 0.0)                              # ReLU
    # Layer 2: [TB,H] @ [H,A_pad] on the MXU; A_pad % 128 == 0 -> lane-dense result.
    y = jnp.dot(h, w2_ref[...], preferred_element_type=jnp.float32)
    out_ref[...] = y + b2_ref[...]                       # bias broadcast over batch


def qnaive_forward(state, w1, b1, w2, b2, *, block_b=512):
    """state: [B, 1]; w1: [1, H]; b1: [1, H]; w2: [H, A]; b2: [1, A] -> [B, A]."""
    state = state.astype(jnp.float32)                    # matches state.float() in the module
    B = state.shape[0]
    H = w1.shape[1]
    A = w2.shape[1]

    # Lane-dense output: pad action dim up to a multiple of 128 (zeros are inert).
    A_pad = max(128, ((A + 127) // 128) * 128)
    w2_p = jnp.pad(w2.astype(jnp.float32), ((0, 0), (0, A_pad - A)))
    b2_p = jnp.pad(b2.astype(jnp.float32), ((0, 0), (0, A_pad - A)))

    # Batch tiling: TB multiple of 8, pad B so it divides evenly into blocks.
    tb = min(block_b, max(8, ((B + 7) // 8) * 8))
    B_pad = ((B + tb - 1) // tb) * tb
    state_p = jnp.pad(state, ((0, B_pad - B), (0, 0)))

    out = pl.pallas_call(
        qnaive_kernel,
        out_shape=jax.ShapeDtypeStruct((B_pad, A_pad), jnp.float32),
        grid=(B_pad // tb,),
        in_specs=[
            pl.BlockSpec((tb, 1), lambda i: (i, 0)),        # state tile, streamed
            pl.BlockSpec((1, H), lambda i: (0, 0)),         # w1, resident
            pl.BlockSpec((1, H), lambda i: (0, 0)),         # b1, resident
            pl.BlockSpec((H, A_pad), lambda i: (0, 0)),     # w2 (padded), resident
            pl.BlockSpec((1, A_pad), lambda i: (0, 0)),     # b2 (padded), resident
        ],
        out_specs=pl.BlockSpec((tb, A_pad), lambda i: (i, 0)),
        compiler_params=pltpu.CompilerParams(
            dimension_semantics=("parallel",),              # 2x on v7x dual-TC
        ),
    )(state_p, w1, b1, w2_p, b2_p)
    return out[:B, :A]


def init_params(key, hidden_dim, n_actions):
    """Deterministic init mimicking PyTorch nn.Linear default (U[-1/sqrt(fan_in), 1/sqrt(fan_in)])."""
    k1, k2, k3, k4 = jax.random.split(key, 4)
    bound1 = 1.0 / math.sqrt(1.0)          # state_embedder: in_features = 1
    bound2 = 1.0 / math.sqrt(hidden_dim)   # fc: in_features = hidden_dim
    # Stored directly in right-multiply form (in_features, out_features).
    w1 = jax.random.uniform(k1, (1, hidden_dim), jnp.float32, -bound1, bound1)
    b1 = jax.random.uniform(k2, (1, hidden_dim), jnp.float32, -bound1, bound1)
    w2 = jax.random.uniform(k3, (hidden_dim, n_actions), jnp.float32, -bound2, bound2)
    b2 = jax.random.uniform(k4, (1, n_actions), jnp.float32, -bound2, bound2)
    return w1, b1, w2, b2


if __name__ == "__main__":
    key = jax.random.PRNGKey(0)
    hidden_dim, n_actions = 32, 4

    k_params, k_state1, k_state2 = jax.random.split(key, 3)
    w1, b1, w2, b2 = init_params(k_params, hidden_dim, n_actions)

    def ref_fn(s):
        return jnp.maximum(s @ w1 + b1, 0.0) @ w2 + b2

    # Small batch: single grid step.
    B = 8
    state = jax.random.normal(k_state1, (B, 1), jnp.float32)
    out = jax.block_until_ready(qnaive_forward(state, w1, b1, w2, b2))
    assert out.shape == (B, n_actions)
    assert jnp.allclose(out, ref_fn(state), atol=1e-5, rtol=1e-5)

    # Ragged batch with multi-step grid + padding path exercised.
    B2 = 200
    state2 = jax.random.normal(k_state2, (B2, 1), jnp.float32)
    out2 = jax.block_until_ready(qnaive_forward(state2, w1, b1, w2, b2, block_b=64))
    assert out2.shape == (B2, n_actions)
    assert jnp.allclose(out2, ref_fn(state2), atol=1e-5, rtol=1e-5)

    print("KERNEL_OK")
</pallas_src>

<mosaic_0001>
module attributes {stable_mosaic.version = 11 : i64} {
  func.func @qnaive_kernel(%arg0: i32, %arg1: memref<8x1xf32, #tpu.memory_space<vmem>>, %arg2: memref<1x32xf32, #tpu.memory_space<vmem>>, %arg3: memref<1x32xf32, #tpu.memory_space<vmem>>, %arg4: memref<32x128xf32, #tpu.memory_space<vmem>>, %arg5: memref<1x128xf32, #tpu.memory_space<vmem>>, %arg6: memref<8x128xf32, #tpu.memory_space<vmem>>) attributes {dimension_semantics = [#tpu.dimension_semantics<parallel>], iteration_bounds = array<i64: 1>, scalar_prefetch = 0 : i64, scratch_operands = 0 : i64, tpu.core_type = #tpu.core_type<tc>, window_params = [{transform_indices = @transform_0, window_bounds = array<i64: 8, 1>}, {pipeline_mode = #tpu.pipeline_mode<synchronous>, transform_indices = @transform_1, window_bounds = array<i64: 1, 32>}, {pipeline_mode = #tpu.pipeline_mode<synchronous>, transform_indices = @transform_2, window_bounds = array<i64: 1, 32>}, {pipeline_mode = #tpu.pipeline_mode<synchronous>, transform_indices = @transform_3, window_bounds = array<i64: 32, 128>}, {pipeline_mode = #tpu.pipeline_mode<synchronous>, transform_indices = @transform_4, window_bounds = array<i64: 1, 128>}, {transform_indices = @transform_5, window_bounds = array<i64: 8, 128>}]} {
    %c0 = arith.constant 0 : index
    %c0_0 = arith.constant 0 : index
    %0 = vector.load %arg1[%c0, %c0_0] : memref<8x1xf32, #tpu.memory_space<vmem>>, vector<8x1xf32>
    %c0_1 = arith.constant 0 : index
    %c0_2 = arith.constant 0 : index
    %1 = vector.load %arg2[%c0_1, %c0_2] : memref<1x32xf32, #tpu.memory_space<vmem>>, vector<1x32xf32>
    %2 = vector.broadcast %0 : vector<8x1xf32> to vector<8x32xf32>
    %3 = vector.broadcast %1 : vector<1x32xf32> to vector<8x32xf32>
    %4 = arith.mulf %2, %3 : vector<8x32xf32>
    %c0_3 = arith.constant 0 : index
    %c0_4 = arith.constant 0 : index
    %5 = vector.load %arg3[%c0_3, %c0_4] : memref<1x32xf32, #tpu.memory_space<vmem>>, vector<1x32xf32>
    %6 = vector.broadcast %5 : vector<1x32xf32> to vector<8x32xf32>
    %7 = arith.addf %4, %6 : vector<8x32xf32>
    %cst = arith.constant 0.000000e+00 : f32
    %8 = vector.broadcast %cst : f32 to vector<8x32xf32>
    %9 = arith.maximumf %7, %8 : vector<8x32xf32>
    %c0_5 = arith.constant 0 : index
    %c0_6 = arith.constant 0 : index
    %10 = vector.load %arg4[%c0_5, %c0_6] : memref<32x128xf32, #tpu.memory_space<vmem>>, vector<32x128xf32>
    %cst_7 = arith.constant dense<0.000000e+00> : vector<8x128xf32>
    %11 = tpu.matmul %9, %10, %cst_7 {dimension_numbers = #tpu.dot_dimension_numbers<[1], [0], [0], [1], [0, 0, 1, 1], [], []>} : vector<8x32xf32>, vector<32x128xf32>, vector<8x128xf32> -> vector<8x128xf32>
    %c0_8 = arith.constant 0 : index
    %c0_9 = arith.constant 0 : index
    %12 = vector.load %arg5[%c0_8, %c0_9] : memref<1x128xf32, #tpu.memory_space<vmem>>, vector<1x128xf32>
    %13 = vector.broadcast %12 : vector<1x128xf32> to vector<8x128xf32>
    %14 = arith.addf %11, %13 : vector<8x128xf32>
    %c0_10 = arith.constant 0 : index
    %c0_11 = arith.constant 0 : index
    %15 = vector.load %arg6[%c0_10, %c0_11] : memref<8x128xf32, #tpu.memory_space<vmem>>, vector<8x128xf32>
    tpu.vector_store %arg6[%c0_10, %c0_11], %14 {strides = array<i32>} : memref<8x128xf32, #tpu.memory_space<vmem>>, vector<8x128xf32>,
    return
  }
  func.func @transform_0(%arg0: i32) -> (i32, i32) {
    %c0_i32 = arith.constant 0 : i32
    %c0_i32_0 = arith.constant 0 : i32
    return %arg0, %c0_i32 : i32, i32
  }
  func.func @transform_1(%arg0: i32) -> (i32, i32) {
    %c0_i32 = arith.constant 0 : i32
    %c0_i32_0 = arith.constant 0 : i32
    %c0_i32_1 = arith.constant 0 : i32
    return %c0_i32, %c0_i32_0 : i32, i32
  }
  func.func @transform_2(%arg0: i32) -> (i32, i32) {
    %c0_i32 = arith.constant 0 : i32
    %c0_i32_0 = arith.constant 0 : i32
    %c0_i32_1 = arith.constant 0 : i32
    return %c0_i32, %c0_i32_0 : i32, i32
  }
  func.func @transform_3(%arg0: i32) -> (i32, i32) {
    %c0_i32 = arith.constant 0 : i32
    %c0_i32_0 = arith.constant 0 : i32
    %c0_i32_1 = arith.constant 0 : i32
    return %c0_i32, %c0_i32_0 : i32, i32
  }
  func.func @transform_4(%arg0: i32) -> (i32, i32) {
    %c0_i32 = arith.constant 0 : i32
    %c0_i32_0 = arith.constant 0 : i32
    %c0_i32_1 = arith.constant 0 : i32
    return %c0_i32, %c0_i32_0 : i32, i32
  }
  func.func @transform_5(%arg0: i32) -> (i32, i32) {
    %c0_i32 = arith.constant 0 : i32
    %c0_i32_0 = arith.constant 0 : i32
    return %arg0, %c0_i32 : i32, i32
  }
}

</mosaic_0001>

<bundles_post_ra>
// kernel: tpu_custom_call.1
= control target key start
LH: loop header
LB: loop body
LE: loop exit
PB: predicated region body
PF: predicated region fallthrough
CT: control target
= control target key end

     0   :  { %10 = vsyncpa [#allocation3], 0  ;;  %s316_s0 = inlined_call_operand.vmem [shape: f32[8,1], index: 0, kind: input, shape index: {}]   ;;  %s317_s1 = inlined_call_operand.vmem [shape: f32[1,32], index: 1, kind: input, shape index: {}]   ;;  %s318_s2 = inlined_call_operand.vmem [shape: f32[1,32], index: 2, kind: input, shape index: {}]   ;;  %s319_s3 = inlined_call_operand.hbm [shape: f32[32,128], index: 3, kind: input, shape index: {}]   ;;  %s320_s4 = inlined_call_operand.vmem [shape: f32[1,128], index: 4, kind: input, shape index: {}]   ;;  %s321_s5 = inlined_call_operand.hbm [shape: f32[8,128], index: 5, kind: output, shape index: {}]  }
   0x1   :  { %11 = vsyncpa [#allocation4], 0  ;;  %s242_s18 = smov [#allocation2]   ;;  %s194_s22 = scalar_lea.hbm %s319_s3, 512 }
   0x2   :  { %s23_s19 = sshll.u32 %s242_s18, 4  ;;  %p195_p0 = scmp.ne.s32.totalorder %s319_s3, %s194_s22  ;;  %s24_s19 = int_to_ptr.vmem [resolvable:$true] %s23_s19 }
   0x3   :  { %p198_p1 = scmp.lt.u32.totalorder %s194_s22, %s319_s3 }
   0x5   :  { %p200_p2 = pnand %p198_p1, %p195_p0 }
   0x7   :  { %203 = shalt.err (!%p200_p2)
}
   0x8   :  { %s204_s27 = scalar_lea.vmem %s24_s19, 512  ;;  %p209_p4 = scmp.lt.s32.totalorder %s24_s19, %s24_s19 }
   0x9   :  { %p205_p3 = scmp.ne.s32.totalorder %s24_s19, %s204_s27  ;;  %p210_p5 = scmp.lt.s32.totalorder %s204_s27, %s204_s27 }
   0xb   :  { %p211_p6 = por %p210_p5, %p209_p4 }
   0xd   :  { %p212_p7 = pnand %p211_p6, %p205_p3 }
   0xf   :  { %215 = shalt.err (!%p212_p7)
}
  0x10   :  { %s243_s28 = smov 128   ;;  %s244_s29 = smov 8  }
  0x11   :  { %29 = dma.hbm_to_vmem [thread:$0]  %s319_s3, 512, %s24_s19, [#allocation3], %s243_s28, %s243_s28, %s244_s29  }
  0x12   :  { %238 = dma.done.wait [#allocation3], 512  }
  0x13   :  { %239 = vsyncadd [#allocation3], 4294966784  ;;  %v245_v0 = vmov 0   ;;  %v246_v1 = vmov 0.0|0.0   ;;  %v35_v2 = vld [vmem:[%s316_s0] sm:$0xff]  ;;  %v59_v4 = vld [vmem:[#allocation2 + $0x8] sm:$0xff] }
  0x14   :  { %193 = vset.pattern.permute.xlu0 %v245_v0  ;;  %179 = vmatprep.subr.bf16.mxu0 %v246_v1  ;;  %v58_v3 = vld [vmem:[#allocation2] sm:$0xff]  ;;  %v60_v6 = vld [vmem:[#allocation2 + $0x10] sm:$0xff]  ;;  %v61_v7 = vld [vmem:[#allocation2 + $0x18] sm:$0xff]  ;;  %vm247_vm0 = vmmov 0   ;;  %v248_v9 = vmov 0.0   ;;  %vm69_vm1 = vcmask 261120  }
  0x15   :  { %39 = vperm.xlu0 %193, %v35_v2   ;;  %v180_v5 = vpack.c.bf16 %v59_v4, %v58_v3  ;;  %v183_v8 = vpack.c.bf16 %v61_v7, %v60_v6  ;;  %176 = vmatprep.mubr.msk.f32.mxu0 %vm247_vm0, %v248_v9  ;;  %v159_v10 = vld [vmem:[%s317_s1] ss:$0 sm:$0xff]  ;;  %s249_s13 = smov [#allocation5]  }
  0x16   :  { %v160_v11 = vld [vmem:[%s318_s2] ss:$0 sm:$0xff]  ;;  %s150_s14 = sshll.u32 %s249_s13, 4  ;;  %s151_s14 = int_to_ptr.vmem [resolvable:$true] %s150_s14 }
  0x17   :  { %181 = vmatpush3.bf16.msra.mxu0 %v180_v5  ;;  %v161_v16 = vld [vmem:[%s320_s4] ss:$0 sm:$0xff]  ;;  %s216_s1 = scalar_lea.vmem %s151_s14, 128  ;;  %p221_p9 = scmp.lt.s32.totalorder %s151_s14, %s151_s14 }
  0x18   :  { %182 = vmatprep.subr.bf16.mxu0 %v246_v1  ;;  %p217_p8 = scmp.ne.s32.totalorder %s151_s14, %s216_s1  ;;  %p222_p10 = scmp.lt.s32.totalorder %s216_s1, %s216_s1 }
  0x1a   :  { %p223_p11 = por %p222_p10, %p221_p9 }
  0x1b   :  { %184 = vmatpush3.bf16.msra.mxu0 %v183_v8 }
  0x1c   :  { %p224_p12 = pnand %p223_p11, %p217_p8 }
  0x94   :  { %v40_v12 = vpop.permute.xlu0 %39 }
  0x95   :  { %v48_v13 = vmul.f32 %v159_v10, %v40_v12 }
  0x97   :  { %v56_v14 = vadd.f32 %v160_v11, %v48_v13 }
  0x99   :  { %v57_v15 = vmax.f32 %v56_v14, 0.0 }
  0x9b   :  { %177 = vmatmul.mubr.msk.f32.vlgmr.msra.gmra.mrb[0].mxu0 %vm69_vm1, %v57_v15 }
 0x16e   :  { %v139_v17 = vpop.f32.mrb[0].mxu0 }
 0x16f   :  { %v140_v18 = vadd.f32 %v161_v16, %v139_v17  ;;  %v178_v19 = vpop.f32.mrb[1].mxu0 }
 0x171   :  { %143 = vst [vmem:[#allocation5] sm:$0xff] %v140_v18 }
 0x172   :  { %227 = shalt.err (!%p224_p12)
}
 0x173   :  { %s228_s16 = scalar_lea.hbm %s321_s5, 128 }
 0x174   :  { %p229_p13 = scmp.ne.s32.totalorder %s321_s5, %s228_s16  ;;  %p232_p0 = scmp.lt.u32.totalorder %s228_s16, %s321_s5 }
 0x176   :  { %p234_p1 = pnand %p232_p0, %p229_p13 }
 0x178   :  { %237 = shalt.err (!%p234_p1)
}
 0x179   :  { %153 = dma.vmem_to_hbm [thread:$0]  %s151_s14, 128, %s321_s5, [#allocation4]  }
 0x17a   :  { %240 = dma.done.wait [#allocation4], 128  }
 0x17b   :  { %241 = vsyncadd [#allocation4], 4294967168 }
 0x17c   :  { %157 = vsyncpa [#allocation3], 1 }
 0x17d   :  { %158 = vsyncpa [#allocation4], 1 }

</bundles_post_ra>
